<compile_context>
chip_gen: v5e
topology: v5e:2x2
jax: 0.10.0
libtpu: 0.0.40
codegen_flags: <defaults>
</compile_context>

<pallas_src>
import functools

import jax
import jax.numpy as jnp
from jax.experimental import pallas as pl
from jax.experimental.pallas import tpu as pltpu


def actor_kernel(action_dim, x_ref, w1_ref, w2_ref, w3_ref, b_ref, o_ref):
    # x_ref: (TB, state_dim) f32; w1/w2 bf16; w3 f32 padded to (hidden, out_pad)
    # b_ref: (1, 2*hidden + out_pad) f32 (b1 | b2 | b3 padded); o_ref: (TB, out_pad) bf16
    hidden = w1_ref.shape[1]

    # In-kernel f32 -> bf16 cast (VPU, hidden under MXU/EUP work).
    x = x_ref[...].astype(jnp.bfloat16)

    h1 = jnp.dot(x, w1_ref[...], preferred_element_type=jnp.float32)
    h1 = jnp.tanh(h1 + b_ref[:, :hidden])

    h2 = jnp.dot(h1.astype(jnp.bfloat16), w2_ref[...],
                 preferred_element_type=jnp.float32)
    h2 = jnp.tanh(h2 + b_ref[:, hidden:2 * hidden])

    # Final layer kept in f32 (K=64: negligible cost, better ratio fidelity).
    logits = jnp.dot(h2, w3_ref[...], preferred_element_type=jnp.float32)
    logits = logits + b_ref[:, 2 * hidden:]

    # Mask the padded lanes explicitly (no sentinel bias values).
    col = jax.lax.broadcasted_iota(jnp.int32, logits.shape, 1)
    logits = jnp.where(col < action_dim, logits, -1e30)

    # Numerically stable softmax over the full lane-dense slab.
    m = jnp.max(logits, axis=-1, keepdims=True)
    e = jnp.exp(logits - m)
    s = jnp.sum(e, axis=-1, keepdims=True)
    r = pl.reciprocal(s, approx=True)
    r = r * (2.0 - s * r)          # one Newton step -> ~exact, rows sum to 1
    o_ref[...] = (e * r).astype(o_ref.dtype)


def _round_up(n, m):
    return ((n + m - 1) // m) * m


def _choose_tb(B, block_b):
    """Batch tile: multiple of 16 (<= B) or the full batch for tiny B."""
    if B <= 16:
        return B                               # single block; block dims == array dims
    tb = (min(_round_up(block_b, 16), B) // 16) * 16
    # Cap so the grid has >= 2 steps -> both v7x TensorCores get work.
    half = _round_up((B + 1) // 2, 16)
    return max(16, min(tb, half))


def prepare_params(params):
    """One-time parameter prep (padding / casts / bias folding).

    Returned dict holds device arrays plus two Python ints ('action_dim',
    'hidden') that must stay static (close over them under jit).
    """
    w1, b1 = params["w1"], params["b1"]
    w2, b2 = params["w2"], params["b2"]
    w3, b3 = params["w3"], params["b3"]
    hidden = w1.shape[1]
    action_dim = w3.shape[1]

    out_pad = _round_up(max(action_dim, 128), 128)   # lane-dense output slab
    w3p = jnp.zeros((hidden, out_pad), jnp.float32).at[:, :action_dim].set(
        w3.astype(jnp.float32))
    b3p = jnp.zeros((1, out_pad), jnp.float32).at[:, :action_dim].set(
        b3.astype(jnp.float32))
    # Fold the three biases into one resident f32 array (single DMA stream).
    bcat = jnp.concatenate(
        [b1.astype(jnp.float32), b2.astype(jnp.float32), b3p], axis=1)

    return {
        "w1": w1.astype(jnp.bfloat16),
        "w2": w2.astype(jnp.bfloat16),
        "w3": w3p,                      # f32, padded (final matmul kept f32)
        "b": bcat,                      # (1, 2*hidden + out_pad) f32
        "action_dim": action_dim,
        "hidden": hidden,
    }


def actor_forward(x, prepared, *, block_b=2048, out_dtype=jnp.bfloat16):
    """x: [B, state_dim] f32. prepared: output of prepare_params()."""
    w1, w2, w3, bcat = prepared["w1"], prepared["w2"], prepared["w3"], prepared["b"]
    action_dim = prepared["action_dim"]
    hidden = prepared["hidden"]

    B, state_dim = x.shape
    out_pad = w3.shape[1]

    tb = _choose_tb(B, block_b)
    grid = (pl.cdiv(B, tb),)   # ragged last block: clipped reads, dropped OOB writes

    out_bytes = jnp.dtype(out_dtype).itemsize
    cost = pl.CostEstimate(
        flops=2 * B * (state_dim * hidden + hidden * hidden + hidden * out_pad),
        transcendentals=B * (2 * hidden + out_pad + 1),
        bytes_accessed=(B * (state_dim * 4 + out_pad * out_bytes)
                        + (w1.size + w2.size) * 2 + w3.size * 4 + bcat.size * 4),
    )

    resident = lambda arr: pl.BlockSpec(arr.shape, lambda i: (0, 0))
    kernel = functools.partial(actor_kernel, action_dim)

    out = pl.pallas_call(
        kernel,
        out_shape=jax.ShapeDtypeStruct((B, out_pad), out_dtype),
        grid=grid,
        in_specs=[
            pl.BlockSpec((tb, state_dim), lambda i: (i, 0)),
            resident(w1), resident(w2), resident(w3), resident(bcat),
        ],
        out_specs=pl.BlockSpec((tb, out_pad), lambda i: (i, 0)),
        compiler_params=pltpu.CompilerParams(
            dimension_semantics=("parallel",)),
        cost_estimate=cost,
    )(x.astype(jnp.float32), w1, w2, w3, bcat)

    return out[:, :action_dim]


def init_params(key, state_dim, action_dim, hidden_dim=64):
    """PyTorch-style Linear init U[-1/sqrt(fan_in), 1/sqrt(fan_in)].
    Weights stored as [in, out] (transposed vs. torch's [out, in])."""
    ks = jax.random.split(key, 6)

    def linear(kw, kb, fan_in, fan_out):
        bound = 1.0 / jnp.sqrt(fan_in)
        w = jax.random.uniform(kw, (fan_in, fan_out), jnp.float32, -bound, bound)
        b = jax.random.uniform(kb, (1, fan_out), jnp.float32, -bound, bound)
        return w, b

    w1, b1 = linear(ks[0], ks[1], state_dim, hidden_dim)
    w2, b2 = linear(ks[2], ks[3], hidden_dim, hidden_dim)
    w3, b3 = linear(ks[4], ks[5], hidden_dim, action_dim)
    return {"w1": w1, "b1": b1, "w2": w2, "b2": b2, "w3": w3, "b3": b3}


def actor_reference(x, params):
    """Pure-JAX f32 reference for correctness checking."""
    h = jnp.tanh(x @ params["w1"] + params["b1"])
    h = jnp.tanh(h @ params["w2"] + params["b2"])
    logits = h @ params["w3"] + params["b3"]
    return jax.nn.softmax(logits, axis=-1)


if __name__ == "__main__":
    key = jax.random.PRNGKey(0)
    k_params, k_x = jax.random.split(key)

    batch = 50          # deliberately not tile-aligned -> exercises ragged last block
    state_dim = 16
    action_dim = 8
    hidden_dim = 64

    params = init_params(k_params, state_dim, action_dim, hidden_dim)
    prepared = prepare_params(params)           # one-time prep, per perf review
    x = jax.random.normal(k_x, (batch, state_dim), jnp.float32)

    # small tile to exercise a multi-step grid; real workloads use default 2048
    forward = jax.jit(lambda s: actor_forward(s, prepared, block_b=16))
    out = jax.block_until_ready(forward(x))

    ref = actor_reference(x, params)
    assert out.shape == (batch, action_dim)
    out_f32 = out.astype(jnp.float32)
    # bf16 matmul inputs (layers 1-2) + bf16 output -> loosened tolerance vs f32 ref
    assert jnp.allclose(out_f32, ref, atol=3e-2, rtol=3e-2), "mismatch vs reference"
    # each row of the softmax output sums to ~1 (bf16 output quantization only)
    assert jnp.allclose(jnp.sum(out_f32, axis=-1), jnp.ones((batch,)), atol=5e-3)

    # tiny-batch path: single full block (B <= 16), default large tile
    out_small = jax.block_until_ready(actor_forward(x[:5], prepared))
    assert out_small.shape == (5, action_dim)
    assert jnp.allclose(out_small.astype(jnp.float32), ref[:5], atol=3e-2, rtol=3e-2)

    print("KERNEL_OK")
</pallas_src>

<mosaic_0001>
module attributes {stable_mosaic.version = 11 : i64} {
  func.func @actor_kernel(%arg0: i32, %arg1: memref<16x16xf32, #tpu.memory_space<vmem>>, %arg2: memref<16x64xbf16, #tpu.memory_space<vmem>>, %arg3: memref<64x64xbf16, #tpu.memory_space<vmem>>, %arg4: memref<64x128xf32, #tpu.memory_space<vmem>>, %arg5: memref<1x256xf32, #tpu.memory_space<vmem>>, %arg6: memref<16x128xbf16, #tpu.memory_space<vmem>>) attributes {dimension_semantics = [#tpu.dimension_semantics<parallel>], iteration_bounds = array<i64: 4>, scalar_prefetch = 0 : i64, scratch_operands = 0 : i64, tpu.core_type = #tpu.core_type<tc>, window_params = [{transform_indices = @transform_0, window_bounds = array<i64: 16, 16>}, {pipeline_mode = #tpu.pipeline_mode<synchronous>, transform_indices = @transform_1, window_bounds = array<i64: 16, 64>}, {pipeline_mode = #tpu.pipeline_mode<synchronous>, transform_indices = @transform_2, window_bounds = array<i64: 64, 64>}, {pipeline_mode = #tpu.pipeline_mode<synchronous>, transform_indices = @transform_3, window_bounds = array<i64: 64, 128>}, {pipeline_mode = #tpu.pipeline_mode<synchronous>, transform_indices = @transform_4, window_bounds = array<i64: 1, 256>}, {transform_indices = @transform_5, window_bounds = array<i64: 16, 128>}]} {
    %c0 = arith.constant 0 : index
    %c0_0 = arith.constant 0 : index
    %0 = vector.load %arg1[%c0, %c0_0] : memref<16x16xf32, #tpu.memory_space<vmem>>, vector<16x16xf32>
    %1 = arith.truncf %0 : vector<16x16xf32> to vector<16x16xbf16>
    %c0_1 = arith.constant 0 : index
    %c0_2 = arith.constant 0 : index
    %2 = vector.load %arg2[%c0_1, %c0_2] : memref<16x64xbf16, #tpu.memory_space<vmem>>, vector<16x64xbf16>
    %cst = arith.constant dense<0.000000e+00> : vector<16x64xf32>
    %3 = tpu.matmul %1, %2, %cst {dimension_numbers = #tpu.dot_dimension_numbers<[1], [0], [0], [1], [0, 0, 1, 1], [], []>} : vector<16x16xbf16>, vector<16x64xbf16>, vector<16x64xf32> -> vector<16x64xf32>
    %c0_3 = arith.constant 0 : index
    %c0_4 = arith.constant 0 : index
    %4 = vector.load %arg5[%c0_3, %c0_4] : memref<1x256xf32, #tpu.memory_space<vmem>>, vector<1x64xf32>
    %5 = vector.broadcast %4 : vector<1x64xf32> to vector<16x64xf32>
    %6 = arith.addf %3, %5 : vector<16x64xf32>
    %7 = math.tanh %6 : vector<16x64xf32>
    %8 = arith.truncf %7 : vector<16x64xf32> to vector<16x64xbf16>
    %c0_5 = arith.constant 0 : index
    %c0_6 = arith.constant 0 : index
    %9 = vector.load %arg3[%c0_5, %c0_6] : memref<64x64xbf16, #tpu.memory_space<vmem>>, vector<64x64xbf16>
    %cst_7 = arith.constant dense<0.000000e+00> : vector<16x64xf32>
    %10 = tpu.matmul %8, %9, %cst_7 {dimension_numbers = #tpu.dot_dimension_numbers<[1], [0], [0], [1], [0, 0, 1, 1], [], []>} : vector<16x64xbf16>, vector<64x64xbf16>, vector<16x64xf32> -> vector<16x64xf32>
    %c0_8 = arith.constant 0 : index
    %c64 = arith.constant 64 : index
    %11 = vector.load %arg5[%c0_8, %c64] : memref<1x256xf32, #tpu.memory_space<vmem>>, vector<1x64xf32>
    %12 = vector.broadcast %11 : vector<1x64xf32> to vector<16x64xf32>
    %13 = arith.addf %10, %12 : vector<16x64xf32>
    %14 = math.tanh %13 : vector<16x64xf32>
    %c0_9 = arith.constant 0 : index
    %c0_10 = arith.constant 0 : index
    %15 = vector.load %arg4[%c0_9, %c0_10] : memref<64x128xf32, #tpu.memory_space<vmem>>, vector<64x128xf32>
    %cst_11 = arith.constant dense<0.000000e+00> : vector<16x128xf32>
    %16 = tpu.matmul %14, %15, %cst_11 {dimension_numbers = #tpu.dot_dimension_numbers<[1], [0], [0], [1], [0, 0, 1, 1], [], []>} : vector<16x64xf32>, vector<64x128xf32>, vector<16x128xf32> -> vector<16x128xf32>
    %c0_12 = arith.constant 0 : index
    %c128 = arith.constant 128 : index
    %17 = vector.load %arg5[%c0_12, %c128] : memref<1x256xf32, #tpu.memory_space<vmem>>, vector<1x128xf32>
    %18 = vector.broadcast %17 : vector<1x128xf32> to vector<16x128xf32>
    %19 = arith.addf %16, %18 : vector<16x128xf32>
    %20 = tpu.iota {dimensions = array<i32: 1>} : vector<16x128xi32>
    %c8_i32 = arith.constant 8 : i32
    %21 = vector.broadcast %c8_i32 : i32 to vector<16x128xi32>
    %22 = arith.cmpi slt, %20, %21 : vector<16x128xi32>
    %cst_13 = arith.constant -1.000000e+30 : f32
    %23 = vector.broadcast %cst_13 : f32 to vector<16x128xf32>
    %24 = arith.select %22, %19, %23 : vector<16x128xi1>, vector<16x128xf32>
    %cst_14 = arith.constant dense<0xFF800000> : vector<16xf32>
    %25 = vector.multi_reduction <maximumf>, %24, %cst_14 [1] : vector<16x128xf32> to vector<16xf32>
    %26 = vector.shape_cast %25 : vector<16xf32> to vector<16x1xf32>
    %27 = vector.broadcast %26 : vector<16x1xf32> to vector<16x128xf32>
    %28 = arith.subf %24, %27 : vector<16x128xf32>
    %29 = math.exp %28 : vector<16x128xf32>
    %cst_15 = arith.constant dense<0.000000e+00> : vector<16xf32>
    %30 = vector.multi_reduction <add>, %29, %cst_15 [1] : vector<16x128xf32> to vector<16xf32>
    %31 = vector.shape_cast %30 : vector<16xf32> to vector<16x1xf32>
    %32 = tpu.reciprocal %31 {approx = true} : vector<16x1xf32> -> vector<16x1xf32>
    %33 = arith.mulf %31, %32 : vector<16x1xf32>
    %cst_16 = arith.constant 2.000000e+00 : f32
    %34 = vector.broadcast %cst_16 : f32 to vector<16x1xf32>
    %35 = arith.subf %34, %33 : vector<16x1xf32>
    %36 = arith.mulf %32, %35 : vector<16x1xf32>
    %37 = vector.broadcast %36 : vector<16x1xf32> to vector<16x128xf32>
    %38 = arith.mulf %29, %37 : vector<16x128xf32>
    %39 = arith.truncf %38 : vector<16x128xf32> to vector<16x128xbf16>
    %c0_17 = arith.constant 0 : index
    %c0_18 = arith.constant 0 : index
    %40 = vector.load %arg6[%c0_17, %c0_18] : memref<16x128xbf16, #tpu.memory_space<vmem>>, vector<16x128xbf16>
    tpu.vector_store %arg6[%c0_17, %c0_18], %39 {strides = array<i32>} : memref<16x128xbf16, #tpu.memory_space<vmem>>, vector<16x128xbf16>,
    return
  }
  func.func @transform_0(%arg0: i32) -> (i32, i32) {
    %c0_i32 = arith.constant 0 : i32
    %c0_i32_0 = arith.constant 0 : i32
    return %arg0, %c0_i32 : i32, i32
  }
  func.func @transform_1(%arg0: i32) -> (i32, i32) {
    %c0_i32 = arith.constant 0 : i32
    %c0_i32_0 = arith.constant 0 : i32
    %c0_i32_1 = arith.constant 0 : i32
    return %c0_i32, %c0_i32_0 : i32, i32
  }
  func.func @transform_2(%arg0: i32) -> (i32, i32) {
    %c0_i32 = arith.constant 0 : i32
    %c0_i32_0 = arith.constant 0 : i32
    %c0_i32_1 = arith.constant 0 : i32
    return %c0_i32, %c0_i32_0 : i32, i32
  }
  func.func @transform_3(%arg0: i32) -> (i32, i32) {
    %c0_i32 = arith.constant 0 : i32
    %c0_i32_0 = arith.constant 0 : i32
    %c0_i32_1 = arith.constant 0 : i32
    return %c0_i32, %c0_i32_0 : i32, i32
  }
  func.func @transform_4(%arg0: i32) -> (i32, i32) {
    %c0_i32 = arith.constant 0 : i32
    %c0_i32_0 = arith.constant 0 : i32
    %c0_i32_1 = arith.constant 0 : i32
    return %c0_i32, %c0_i32_0 : i32, i32
  }
  func.func @transform_5(%arg0: i32) -> (i32, i32) {
    %c0_i32 = arith.constant 0 : i32
    %c0_i32_0 = arith.constant 0 : i32
    return %arg0, %c0_i32 : i32, i32
  }
}

</mosaic_0001>

<bundles_post_ra>
// kernel: _lambda_.1
= control target key start
LH: loop header
LB: loop body
LE: loop exit
PB: predicated region body
PF: predicated region fallthrough
CT: control target
= control target key end

     0   :  { %10 = vsyncpa [#allocation3], 0  ;;  %s1000_s18 = smov 0   ;;  %s1002_s19 = smov 0   ;;  %s1128_s0 = inlined_call_operand.vmem [shape: f32[50,16], index: 0, kind: input, shape index: {}]   ;;  %s1129_s1 = inlined_call_operand.vmem [shape: bf16[16,64], index: 1, kind: input, shape index: {}]   ;;  %s1130_s2 = inlined_call_operand.hbm [shape: bf16[64,64], index: 2, kind: input, shape index: {}]   ;;  %s1131_s3 = inlined_call_operand.vmem [shape: f32[64,128], index: 3, kind: input, shape index: {}]   ;;  %s1132_s4 = inlined_call_operand.vmem [shape: f32[1,256], index: 4, kind: input, shape index: {}]   ;;  %s1133_s5 = inlined_call_operand.vmem [shape: bf16[50,128], index: 5, kind: output, shape index: {}]  }
   0x1   :  { %s1004_s20 = smov 0  }
   0x2 LB: > { %s1013_s21 = sadd.s32 4294967295, %s932_s20   ;;  %s1015_s22 = sadd.s32 1, %s932_s20   ;;  %s932_s20 = sphi %s1004_s20, %s1137_s20   ;;  %s928_s19 = sphi %s1002_s19, %s1136_s19   ;;  %s924_s18 = sphi %s1000_s18, %s1135_s18  }
   0x3   : > { %s130_s23 = ssub.s32 %s932_s20, %s1015_s22  ;;  %s133_s24 = sadd.s32 1, %s928_s19 }
   0x4   : > { %p131_p0 = scmp.eq.s32.totalorder %s130_s23, 0  ;;  %p143_p1 = scmp.ne.s32.totalorder %s928_s19, %s924_s18 }
   0x5   : > { %p144_p2 = scmp.eq.s32.totalorder %s1013_s21, 3  ;;  %p662_p3 = scmp.ge.s32.totalorder %s932_s20, 1 }
   0x6   : > { %s1023_s25 = scalar_select %p131_p0, %s928_s19, %s133_s24  }
   0x7   : > { %p1025_p4 = por %p144_p2, %p143_p1  ;;  %p157_p5 = scmp.lt.s32.totalorder %s932_s20, 5 }
   0x8   : > { %p732_p6 = scmp.eq.s32.totalorder %s1013_s21, 0  ;;  %s171_s29 = sshll.u32 %s1130_s2, 4  ;;  %s172_s29 = int_to_ptr.hbm [resolvable:$true] %s171_s29 }
   0x9   : > { %p158_p7 = pnand %p662_p3, %p157_p5  ;;  %s966_s30 = smov [#allocation2]  }
   0xa   : > { %s173_s6 = sshll.u32 %s966_s30, 4  ;;  %s967_s7 = smov 64   ;;  %s174_s6 = int_to_ptr.vmem [resolvable:$true] %s173_s6 }
   0xb   : > { %p728_p8 = pneg %p158_p7  ;;  %s968_s8 = smov 4  }
   0xc   : > { %212 = sbr.rel (%p158_p7) target bundleno = 751 (0x2ef), region = 40 }
   0xd   : > { %p729_p9 = pnand %p732_p6, %p728_p8 }
   0xf   : > { %731 = dma.hbm_to_vmem [thread:$0]  (!%p729_p9), %s172_s29, 512, %s174_s6, [#allocation3], %s967_s7, %s967_s7, %s968_s8  }
  0x11   : > { %919 = dma.done.wait (%p732_p6), [#allocation3], 512  }
  0x12   : > { %921 = vsyncadd (%p732_p6), [#allocation3], 4294966784  ;;  %s1040_s9 = sshll.u32 %s1013_s21, 1  ;;  %v711_v0 = vld [vmem:[%s1129_s1] sm:$0xff]  ;;  %vm279_vm0 = vcmask 130048   ;;  %s969_s23 = smov 64   ;;  %v396_v31 = vlaneseq }
  0x13   : > { %p249_p10 = scmp.lt.s32.totalorder %s1040_s9, 6  ;;  %290 = vmatpush.bf16.msra.mxu0 %v711_v0  ;;  %v826_v4 = vld [vmem:[%s1132_s4] ss:$0 sm:$0xff]  ;;  %v715_v5 = vld [vmem:[#allocation2 + $0x18] sm:$0xff]  ;;  %v714_v6 = vld [vmem:[#allocation2 + $0x10] sm:$0xff]  ;;  %vm335_vm1 = vcmask 523264  }
  0x14   : > { %332 = vrot.lane.b32.xlu0 %v826_v4, %s969_s23  ;;  %343 = vmatpush.bf16.msra.mxu1 %v715_v5  ;;  %v713_v7 = vld [vmem:[#allocation2 + $0x8] sm:$0xff]  ;;  %v712_v8 = vld [vmem:[#allocation2] sm:$0xff]  ;;  %v362_v9 = vld [vmem:[%s1131_s3 + $0x38] sm:$0xff]  ;;  %v397_v32 = vand.u32 127, %v396_v31  ;;  %s241_s24 = sand.u32 1, %s924_s18   ;;  %s437_s29 = ssub.s32 (%p1025_p4), 7, %s1040_s9 }
  0x15   : > { %s250_s10 = scalar_select %p249_p10, %s1040_s9, 6  ;;  %v361_v10 = vld [vmem:[%s1131_s3 + $0x30] sm:$0xff]  ;;  %381 = vmatpush.msra.mxu2 %v362_v9  ;;  %v360_v11 = vld [vmem:[%s1131_s3 + $0x28] sm:$0xff]  ;;  %v359_v19 = vld [vmem:[%s1131_s3 + $0x20] sm:$0xff] }
  0x16   : > { %v358_v20 = vld [vmem:[%s1131_s3 + $0x18] sm:$0xff]  ;;  %v357_v21 = vld [vmem:[%s1131_s3 + $0x10] sm:$0xff]  ;;  %v356_v22 = vld [vmem:[%s1131_s3 + $0x8] sm:$0xff]  ;;  %vm398_vm2 = vcmp.lt.s32.totalorder %v397_v32, 8  ;;  %s667_s27 = sshll.u32 %s241_s24, 3  ;;  %s716_s30 = sshll.u32 (%p1025_p4), %s1013_s21, 3 }
  0x17   : > { %s669_s11 = sshll.u32 %s250_s10, 3  ;;  %382 = vmatpush.msra.mxu2 %v361_v10  ;;  %v355_v23 = vld [vmem:[%s1131_s3] sm:$0xff]  ;;  %s1084_s28 = scalar_lea.vmem [#allocation4], %s667_s27  }
  0x18   : > { %s252_s14 = scalar_lea.vmem %s1128_s0, %s669_s11  ;;  %344 = vmatpush.bf16.msra.mxu1 %v714_v6  ;;  %v827_v33 = vld [vmem:[%s1132_s4 + $0x1] ss:$0 sm:$0xff]  ;;  %p438_p11 = scmp.lt.s32.totalorder (%p1025_p4), %s437_s29, 2 }
  0x19   : > { %v264_v1 = vld [vmem:[%s252_s14] sm:$0xff]  ;;  %v265_v2 = vld [vmem:[%s252_s14 + $0x8] sm:$0xff]  ;;  %383 = vmatpush.msra.mxu2 %v360_v11  ;;  %s1094_s7 = scalar_lea.vmem (%p1025_p4), %s1133_s5, %s716_s30  }
  0x1a   : > { %v266_v3 = vpack.c.bf16 %v265_v2, %v264_v1 }
  0x1b   : > { %384 = vmatpush.msra.mxu2 %v359_v19 }
  0x1c   : > { %674 = vmatmul.msk.bf16.vlgmr.msra.gmra.mxu0 %vm279_vm0, %v266_v3  ;;  %345 = vmatpush.bf16.msra.mxu1 %v713_v7 }
  0x1d   : > { %385 = vmatpush.msra.mxu2 %v358_v20 }
  0x1f   : > { %386 = vmatpush.msra.mxu2 %v357_v21 }
  0x20   : > { %346 = vmatpush.bf16.msra.mxu1 %v712_v8 }
  0x21   : > { %387 = vmatpush.msra.mxu2 %v356_v22 }
  0x23   : > { %388 = vmatpush.msra.mxu2 %v355_v23 }
  0x86   : > { %v333_v24 = vpop.permute.xlu0 %332 }
  0x99   : > { %v292_v12 = vpop.f32.mrf.mxu0 }
  0x9a   : > { %v293_v13 = vadd.f32 %v826_v4, %v292_v12 }
  0x9c   : > { %828 = vtanh.f32 %v293_v13 }
  0xa1   : > { %v294_v14 = vpop.f32.mrf.mxu0 }
  0xa2   : > { %v295_v15 = vadd.f32 %v826_v4, %v294_v14  ;;  %v829_v16 = vpop.eup %828 }
  0xa4   : > { %830 = vtanh.f32 %v295_v15 }
  0xaa   : > { %v831_v17 = vpop.eup %830 }
  0xab   : > { %v299_v18 = vpack.c.bf16 %v831_v17, %v829_v16 }
  0xad   : > { %691 = vmatmul.msk.bf16.vlgmr.msra.gmra.mxu1 %vm335_vm1, %v299_v18 }
 0x12a   : > { %v348_v25 = vpop.f32.mrf.mxu1 }
 0x12b   : > { %v349_v26 = vadd.f32 %v348_v25, %v333_v24 }
 0x12d   : > { %832 = vtanh.f32 %v349_v26 }
 0x132   : > { %v350_v27 = vpop.f32.mrf.mxu1 }
 0x133   : > { %v833_v28 = vpop.eup %832  ;;  %v351_v29 = vadd.f32 %v350_v27, %v333_v24 }
 0x134   : > { %692 = vmatmul.msk.f32.vlgmr.msra.gmra.mxu2 %vm335_vm1, %v833_v28 }
 0x135   : > { %834 = vtanh.f32 %v351_v29 }
 0x13b   : > { %v835_v30 = vpop.eup %834 }
 0x13c   : > { %693 = vmatmul.msk.f32.gmra.mxu2 %vm335_vm1, %v835_v30 }
 0x1b7   : > { %v390_v34 = vpop.f32.mrf.mxu2 }
 0x1b8   : > { %v391_v35 = vadd.f32 %v827_v33, %v390_v34 }
 0x1ba   : > { %v399_v36 = vsel %vm398_vm2, %v391_v35, -1e+30 }
 0x1bb   : > { %401 = vmax.xlane.f32.xlu0 %v399_v36 }
 0x1bf   : > { %v393_v37 = vpop.f32.mrf.mxu2 }
 0x1c0   : > { %v394_v38 = vadd.f32 %v827_v33, %v393_v37 }
 0x1c2   : > { %v400_v39 = vsel %vm398_vm2, %v394_v38, -1e+30 }
 0x1c3   : > { %403 = vmax.xlane.f32.xlu1 %v400_v39 }
 0x22e   : > { %v402_v40 = vpop.xlane.xlu0 %401 }
 0x22f   : > { %v405_v41 = vsub.f32 %v399_v36, %v402_v40 }
 0x231   : > { %v407_v42 = vmul.f32 1.442695, %v405_v41 }
 0x233   : > { %836 = vpow2.f32 %v407_v42 }
 0x236   : > { %v404_v43 = vpop.xlane.xlu1 %403 }
 0x237   : > { %v406_v44 = vsub.f32 %v400_v39, %v404_v43 }
 0x239   : > { %v837_v45 = vpop.eup %836  ;;  %v409_v46 = vmul.f32 1.442695, %v406_v44 }
 0x23a   : > { %411 = vadd.xlane.f32.xlu1 %v837_v45 }
 0x23b   : > { %838 = vpow2.f32 %v409_v46 }
 0x241   : > { %v839_v47 = vpop.eup %838 }
 0x242   : > { %413 = vadd.xlane.f32.xlu2 %v839_v47 }
 0x2ad   : > { %v412_v48 = vpop.xlane.xlu1 %411 }
 0x2ae   : > { %840 = vrcp.f32 %v412_v48 }
 0x2b4   : > { %v841_v49 = vpop.eup %840 }
 0x2b5   : > { %v414_v50 = vpop.xlane.xlu2 %413  ;;  %v417_v51 = vmul.f32 %v841_v49, %v412_v48 }
 0x2b6   : > { %842 = vrcp.f32 %v414_v50 }
 0x2b7   : > { %v419_v52 = vsub.f32 2.0, %v417_v51 }
 0x2b9   : > { %v421_v55 = vmul.f32 %v841_v49, %v419_v52 }
 0x2bb   : > { %v423_v58 = vmul.f32 %v837_v45, %v421_v55 }
 0x2bc   : > { %v843_v53 = vpop.eup %842 }
 0x2bd   : > { %v418_v54 = vmul.f32 %v843_v53, %v414_v50 }
 0x2bf   : > { %v420_v56 = vsub.f32 2.0, %v418_v54 }
 0x2c1   : > { %v422_v57 = vmul.f32 %v843_v53, %v420_v56 }
 0x2c3   : > { %v424_v59 = vmul.f32 %v839_v47, %v422_v57  ;;  %435 = sbr.rel (!%p1025_p4) target bundleno = 751 (0x2ef), region = 48 }
 0x2c5   : > { %v722_v60 = vpack.c.bf16 %v424_v59, %v423_v58 }
 0x2c7   : > { %723 = vst [vmem:[%s1084_s28] sm:$0xff] %v722_v60  }
 0x2c8   : > { %s1139_s29 = smov (!%p438_p11, %s437_s29), 2 }
 0x2c9   : > { %s696_s8 = sshll.u32 %s1139_s29, 2 }
 0x2ca   : > { %p699_p12 = scmp.eq.s32.totalorder %s696_s8, 0 }
 0x2cb   : > { %s1100_s10 = sshrl.u32 (!%p699_p12), %s1139_s29, 1 }
 0x2cc   : > { %446 = sbr.rel (%p699_p12) target bundleno = 751 (0x2ef), region = 52  ;;  %p700_p13 = scmp.le.s32.totalorder (!%p699_p12), %s1100_s10, 0 }
 0x2d1   : > { %608 = sbr.rel (%p700_p13) target bundleno = 734 (0x2de), region = 125  ;;  %s934_s21 = smov (!%p700_p13), %s1094_s7  }
 0x2d2   : > { %s938_s26 = smov (!%p700_p13), %s1084_s28   ;;  %s942_s9 = smov (!%p700_p13), 0  }
 0x2d3   : > { %s946_s11 = smov (!%p700_p13), 0  }
 0x2d6 LB: >> { %v463_v61 = vld [vmem:[%s940_s26] sm:$0xf]  ;;  %v465_v62 = vld [vmem:[%s940_s26 + $0x4] sm:$0xf]  ;;  %s467_s12 = sadd.s32 1, %s944_s9  ;;  %s457_s11 = sadd.s32 1, %s948_s11   ;;  %s948_s11 = sphi %s946_s11, %s457_s11   ;;  %s944_s9 = sphi %s942_s9, %s943_s9   ;;  %s940_s26 = sphi %s938_s26, %s472_s26   ;;  %s936_s21 = sphi %s934_s21, %s473_s21  }
 0x2d7   : >> { %464 = vst [vmem:[%s936_s21] sm:$0xf] %v463_v61  ;;  %p468_p0 = scmp.ge.s32.totalorder %s467_s12, %s1100_s10  ;;  %p456_p1 = scmp.ge.s32.totalorder %s457_s11, %s1100_s10 }
 0x2d8   : >> { %466 = vst [vmem:[%s936_s21 + $0x4] sm:$0xf] %v465_v62 }
 0x2d9   : >> { %s1141_s12 = smov (%p468_p0, %s467_s12), 0  ;;  %459 = sbr.rel (!%p456_p1) target bundleno = 726 (0x2d6), region = 131 }
 0x2da   : >> { %s701_s13 = sshll.u32 %s1141_s12, 3  ;;  %s943_s9 = smov %s1141_s12  }
 0x2db   : >> { %s472_s26 = scalar_lea.vmem %s1084_s28, %s701_s13 [#allocation4]   ;;  %s473_s21 = scalar_lea.vmem %s1094_s7, %s701_s13  }
 0x2de PF: > { %s1110_s14 = sand.u32 1, %s1139_s29   ;;  %s717_s15 = sshll.u32 %s1100_s10, 3 }
 0x2df   : > { %s478_s16 = scalar_lea.vmem %s1084_s28, %s717_s15 [#allocation4]   ;;  %s480_s17 = scalar_lea.vmem %s1094_s7, %s717_s15  }
 0x2e0   : > { %p706_p2 = scmp.le.s32.totalorder %s1110_s14, 0 }
 0x2e1   : > { %s950_s20 = smov (!%p706_p2), %s480_s17   ;;  %s954_s23 = smov (!%p706_p2), %s478_s16  }
 0x2e2   : > { %622 = sbr.rel (%p706_p2) target bundleno = 751 (0x2ef), region = 136  ;;  %s958_s24 = smov (!%p706_p2), 0  }
 0x2e3   : > { %s962_s27 = smov (!%p706_p2), 0  }
 0x2e7 LB: >> { %v490_v63 = vld [vmem:[%s956_s23] sm:$0xf]  ;;  %s492_s29 = sadd.s32 1, %s960_s24  ;;  %s484_s27 = sadd.s32 1, %s964_s27   ;;  %s964_s27 = sphi %s962_s27, %s484_s27   ;;  %s960_s24 = sphi %s958_s24, %s959_s24   ;;  %s956_s23 = sphi %s954_s23, %s497_s23   ;;  %s952_s20 = sphi %s950_s20, %s498_s20  }
 0x2e8   : >> { %491 = vst [vmem:[%s952_s20] sm:$0xf] %v490_v63  ;;  %p493_p3 = scmp.ge.s32.totalorder %s492_s29, %s1110_s14  ;;  %p483_p4 = scmp.ge.s32.totalorder %s484_s27, %s1110_s14 }
 0x2ea   : >> { %s1143_s29 = smov (%p493_p3, %s492_s29), 0  ;;  %486 = sbr.rel (!%p483_p4) target bundleno = 743 (0x2e7), region = 142 }
 0x2eb   : >> { %s707_s28 = sshll.u32 %s1143_s29, 2  ;;  %s959_s24 = smov %s1143_s29  }
 0x2ec   : >> { %s497_s23 = scalar_lea.vmem %s478_s16, %s707_s28 [#allocation4]   ;;  %s498_s20 = scalar_lea.vmem %s480_s17, %s707_s28  }
 0x2ef PF: > { %p13_p5 = scmp.ge.s32.totalorder %s1015_s22, 6   ;;  %s1135_s18 = smov %s928_s19 }
 0x2f0   : > { %s1136_s19 = smov %s1023_s25  ;;  %s1137_s20 = smov %s1015_s22 }
 0x2f1   :  { %15 = sbr.rel (!%p13_p5) target bundleno = 2 (0x2), region = 153 }
 0x2f6   :  { %562 = vsyncpa [#allocation3], 1 }
 0x2f7   :  { %564 = vsyncpa [#allocation3 + $0x1], 1 }

</bundles_post_ra>
